<compile_context>
chip_gen: v6e
topology: v6e:2x2x1
jax: 0.10.0
libtpu: 0.0.40
codegen_flags: <defaults>
</compile_context>

<pallas_src>
import functools

import jax
import jax.numpy as jnp
from jax.experimental import pallas as pl
from jax.experimental.pallas import tpu as pltpu

EPS = 1e-6


def _ds_partials_kernel(pred_ref, tgt_ref, out_ref,
                        acc_i, acc_pt, acc_ce):
    """Accumulates per-class partial sums for one batch row.

    pred_ref: (1, C, T) logits block (pixels on lanes)
    tgt_ref : (1, 1, T) int32 class indices
    out_ref : (1, C, 3) per-batch partials: [intersection, probs+onehot, ce] per class
    acc_*   : (C, T) f32 lane-dense elementwise accumulators
    """
    j = pl.program_id(1)

    @pl.when(j == 0)
    def _init():
        acc_i[...] = jnp.zeros_like(acc_i)
        acc_pt[...] = jnp.zeros_like(acc_pt)
        acc_ce[...] = jnp.zeros_like(acc_ce)

    logits = pred_ref[0, :, :].astype(jnp.float32)      # (C, T)
    tgt = tgt_ref[0, :, :]                              # (1, T) int32
    c, t = logits.shape

    # numerically-stable softmax / log-softmax over the class (sublane) axis
    m = jnp.max(logits, axis=0, keepdims=True)          # (1, T)   XLU
    shifted = logits - m                                 # (C, T)   VPU
    ex = jnp.exp(shifted)                                # (C, T)   EUP
    s = jnp.sum(ex, axis=0, keepdims=True)               # (1, T)   XLU
    probs = ex * pl.reciprocal(s, approx=True)           # (C, T)   VPU (+EUP recip)
    logs = jnp.log(s)                                    # (1, T)   EUP

    class_ids = jax.lax.broadcasted_iota(jnp.int32, (c, t), 0)
    onehot = (class_ids == tgt).astype(jnp.float32)       # (C, T)

    # Elementwise lane-dense accumulation (pure VPU); cross-lane reductions deferred.
    acc_i[...] += probs * onehot                          # intersection partials
    acc_pt[...] += probs + onehot                         # dice-denominator partials
    acc_ce[...] += onehot * (logs - shifted)              # -log p[target] partials

    @pl.when(j == pl.num_programs(1) - 1)
    def _finalize():
        inter = jnp.sum(acc_i[...], axis=-1, keepdims=True)    # (C, 1)   XLU
        ptsum = jnp.sum(acc_pt[...], axis=-1, keepdims=True)   # (C, 1)
        cesum = jnp.sum(acc_ce[...], axis=-1, keepdims=True)   # (C, 1)
        out_ref[0, :, :] = jnp.concatenate([inter, ptsum, cesum], axis=-1)


def _pick_tile_hw(hw, c):
    """Largest pixel tile that divides hw, is a multiple of 128 (or == hw),
    and keeps a single logits copy at roughly <= 2 MiB (so double-buffered
    inputs + three accumulators stay far under the scoped-VMEM default)."""
    cap = max(128, min(8192, (2 * 1024 * 1024) // max(1, 4 * c)))
    cap -= cap % 128
    if cap < 128:
        cap = 128
    if hw <= cap:
        return hw                      # full extent is always a legal block dim
    if hw % 128 == 0:
        t = cap
        while t >= 128:
            if hw % t == 0:
                return t
            t -= 128
    # TODO(synk): pad awkward spatial sizes to a multiple of 128 (with masking)
    return hw


@functools.partial(jax.jit, static_argnames=("tile_hw",))
def _ds_loss_from_flat(pred_ncp, tgt_n1p, tile_hw):
    """pred_ncp: (N, C, HW) logits; tgt_n1p: (N, 1, HW) int32 class indices."""
    N, C, HW = pred_ncp.shape
    assert HW % tile_hw == 0
    grid = (N, HW // tile_hw)

    bytes_in = (pred_ncp.size * pred_ncp.dtype.itemsize
                + tgt_n1p.size * tgt_n1p.dtype.itemsize)
    cost = pl.CostEstimate(
        flops=int(12 * N * C * HW),
        transcendentals=int(N * (C + 2) * HW),
        bytes_accessed=int(bytes_in + N * C * 3 * 4),
    )

    parts = pl.pallas_call(
        _ds_partials_kernel,
        out_shape=jax.ShapeDtypeStruct((N, C, 3), jnp.float32),
        grid_spec=pltpu.PrefetchScalarGridSpec(
            num_scalar_prefetch=0,
            grid=grid,
            in_specs=[
                pl.BlockSpec((1, C, tile_hw), lambda n, j: (n, 0, j)),
                pl.BlockSpec((1, 1, tile_hw), lambda n, j: (n, 0, j)),
            ],
            out_specs=pl.BlockSpec((1, C, 3), lambda n, j: (n, 0, 0)),
            scratch_shapes=[
                pltpu.VMEM((C, tile_hw), jnp.float32),   # intersection partials
                pltpu.VMEM((C, tile_hw), jnp.float32),   # probs + onehot partials
                pltpu.VMEM((C, tile_hw), jnp.float32),   # cross-entropy partials
            ],
        ),
        compiler_params=pltpu.CompilerParams(
            dimension_semantics=("parallel", "arbitrary")),
        cost_estimate=cost,
    )(pred_ncp, tgt_n1p)

    # tiny finalize in the wrapper (combines per-batch partials)
    sums = jnp.sum(parts, axis=0)                       # (C, 3)
    inter, ptsum, cesum = sums[:, 0], sums[:, 1], sums[:, 2]
    dice = (2.0 * inter + EPS) / (ptsum + EPS)
    dice_loss = 1.0 - jnp.mean(dice)
    log_cosh_dice = jnp.log(jnp.cosh(dice_loss))
    ce_mean = jnp.sum(cesum) / jnp.float32(N * HW)
    return log_cosh_dice + ce_mean


def ds_loss_all(prediction_list, target_list):
    """Mirrors DS_Loss_all.forward: loss = 1.0 * DS_Loss(pred[0], squeeze(target[0],1).long())."""
    pred = prediction_list[0]                                      # (N, C, H, W)
    label = jnp.squeeze(target_list[0], axis=1).astype(jnp.int32)  # (N, H, W)
    N, C, H, W = pred.shape
    HW = H * W
    # Free reshapes only -- no HBM transpose before the kernel.
    pred_ncp = pred.reshape(N, C, HW)
    tgt_n1p = label.reshape(N, 1, HW)
    tile_hw = _pick_tile_hw(HW, C)
    return 1.0 * _ds_loss_from_flat(pred_ncp, tgt_n1p, tile_hw=tile_hw)


if __name__ == "__main__":
    key = jax.random.PRNGKey(0)
    N, C, H, W = 2, 4, 16, 16

    pred_keys = jax.random.split(key, 7)
    # 6 deep-supervision prediction heads (only [0] is used by the loss, as in PyTorch)
    prediction_list = [
        jax.random.normal(pred_keys[i], (N, C, H, W), dtype=jnp.float32)
        for i in range(6)
    ]
    # 6 targets of shape (N, 1, H, W) holding integer class labels (stored as float,
    # cast to int inside ds_loss_all, matching `.long()`)
    tgt_keys = jax.random.split(pred_keys[6], 6)
    target_list = [
        jax.random.randint(tgt_keys[i], (N, 1, H, W), 0, C).astype(jnp.float32)
        for i in range(6)
    ]

    loss = ds_loss_all(prediction_list, target_list)
    jax.block_until_ready(loss)
    assert loss.shape == () and jnp.isfinite(loss)
    print("KERNEL_OK")
</pallas_src>

<mosaic_0001>
module attributes {stable_mosaic.version = 11 : i64} {
  func.func @_ds_partials_kernel(%arg0: i32, %arg1: i32, %arg2: memref<1x4x256xf32, #tpu.memory_space<vmem>>, %arg3: memref<1x1x256xi32, #tpu.memory_space<vmem>>, %arg4: memref<1x4x3xf32, #tpu.memory_space<vmem>>, %arg5: memref<4x256xf32, #tpu.memory_space<vmem>>, %arg6: memref<4x256xf32, #tpu.memory_space<vmem>>, %arg7: memref<4x256xf32, #tpu.memory_space<vmem>>) attributes {dimension_semantics = [#tpu.dimension_semantics<parallel>, #tpu.dimension_semantics<arbitrary>], iteration_bounds = array<i64: 2, 1>, scalar_prefetch = 0 : i64, scratch_operands = 3 : i64, tpu.core_type = #tpu.core_type<tc>, window_params = [{transform_indices = @transform_0, window_bounds = array<i64: 1, 4, 256>}, {transform_indices = @transform_1, window_bounds = array<i64: 1, 1, 256>}, {transform_indices = @transform_2, window_bounds = array<i64: 1, 4, 3>}]} {
    %c0_i32 = arith.constant 0 : i32
    %0 = arith.cmpi eq, %arg1, %c0_i32 : i32
    %1 = arith.extui %0 : i1 to i32
    %c0_i32_0 = arith.constant 0 : i32
    %2 = arith.cmpi ne, %1, %c0_i32_0 : i32
    scf.if %2 {
      %cst_21 = arith.constant 0.000000e+00 : f32
      %40 = vector.broadcast %cst_21 : f32 to vector<4x256xf32>
      %c0_22 = arith.constant 0 : index
      %c0_23 = arith.constant 0 : index
      %41 = vector.load %arg5[%c0_22, %c0_23] : memref<4x256xf32, #tpu.memory_space<vmem>>, vector<4x256xf32>
      tpu.vector_store %arg5[%c0_22, %c0_23], %40 {strides = array<i32>} : memref<4x256xf32, #tpu.memory_space<vmem>>, vector<4x256xf32>,
      %cst_24 = arith.constant 0.000000e+00 : f32
      %42 = vector.broadcast %cst_24 : f32 to vector<4x256xf32>
      %c0_25 = arith.constant 0 : index
      %c0_26 = arith.constant 0 : index
      %43 = vector.load %arg6[%c0_25, %c0_26] : memref<4x256xf32, #tpu.memory_space<vmem>>, vector<4x256xf32>
      tpu.vector_store %arg6[%c0_25, %c0_26], %42 {strides = array<i32>} : memref<4x256xf32, #tpu.memory_space<vmem>>, vector<4x256xf32>,
      %cst_27 = arith.constant 0.000000e+00 : f32
      %44 = vector.broadcast %cst_27 : f32 to vector<4x256xf32>
      %c0_28 = arith.constant 0 : index
      %c0_29 = arith.constant 0 : index
      %45 = vector.load %arg7[%c0_28, %c0_29] : memref<4x256xf32, #tpu.memory_space<vmem>>, vector<4x256xf32>
      tpu.vector_store %arg7[%c0_28, %c0_29], %44 {strides = array<i32>} : memref<4x256xf32, #tpu.memory_space<vmem>>, vector<4x256xf32>,
    } else {
    }
    %c0 = arith.constant 0 : index
    %c0_1 = arith.constant 0 : index
    %c0_2 = arith.constant 0 : index
    %3 = vector.load %arg2[%c0, %c0_1, %c0_2] : memref<1x4x256xf32, #tpu.memory_space<vmem>>, vector<1x4x256xf32>
    %4 = vector.shape_cast %3 : vector<1x4x256xf32> to vector<4x256xf32>
    %c0_3 = arith.constant 0 : index
    %c0_4 = arith.constant 0 : index
    %c0_5 = arith.constant 0 : index
    %5 = vector.load %arg3[%c0_3, %c0_4, %c0_5] : memref<1x1x256xi32, #tpu.memory_space<vmem>>, vector<1x1x256xi32>
    %6 = vector.shape_cast %5 : vector<1x1x256xi32> to vector<1x256xi32>
    %cst = arith.constant dense<0xFF800000> : vector<256xf32>
    %7 = vector.multi_reduction <maximumf>, %4, %cst [0] : vector<4x256xf32> to vector<256xf32>
    %8 = vector.shape_cast %7 : vector<256xf32> to vector<1x256xf32>
    %9 = vector.broadcast %8 : vector<1x256xf32> to vector<4x256xf32>
    %10 = arith.subf %4, %9 : vector<4x256xf32>
    %11 = math.exp %10 : vector<4x256xf32>
    %cst_6 = arith.constant dense<0.000000e+00> : vector<256xf32>
    %12 = vector.multi_reduction <add>, %11, %cst_6 [0] : vector<4x256xf32> to vector<256xf32>
    %13 = vector.shape_cast %12 : vector<256xf32> to vector<1x256xf32>
    %14 = tpu.reciprocal %13 {approx = true} : vector<1x256xf32> -> vector<1x256xf32>
    %15 = vector.broadcast %14 : vector<1x256xf32> to vector<4x256xf32>
    %16 = arith.mulf %11, %15 : vector<4x256xf32>
    %17 = math.log %13 : vector<1x256xf32>
    %18 = tpu.iota {dimensions = array<i32: 0>} : vector<4x256xi32>
    %19 = vector.broadcast %6 : vector<1x256xi32> to vector<4x256xi32>
    %20 = arith.cmpi eq, %18, %19 : vector<4x256xi32>
    %21 = arith.extui %20 : vector<4x256xi1> to vector<4x256xi32>
    %22 = arith.sitofp %21 : vector<4x256xi32> to vector<4x256xf32>
    %c0_7 = arith.constant 0 : index
    %c0_8 = arith.constant 0 : index
    %23 = vector.load %arg5[%c0_7, %c0_8] : memref<4x256xf32, #tpu.memory_space<vmem>>, vector<4x256xf32>
    %24 = arith.mulf %16, %22 : vector<4x256xf32>
    %25 = arith.addf %23, %24 : vector<4x256xf32>
    %c0_9 = arith.constant 0 : index
    %c0_10 = arith.constant 0 : index
    %26 = vector.load %arg5[%c0_9, %c0_10] : memref<4x256xf32, #tpu.memory_space<vmem>>, vector<4x256xf32>
    tpu.vector_store %arg5[%c0_9, %c0_10], %25 {strides = array<i32>} : memref<4x256xf32, #tpu.memory_space<vmem>>, vector<4x256xf32>,
    %c0_11 = arith.constant 0 : index
    %c0_12 = arith.constant 0 : index
    %27 = vector.load %arg6[%c0_11, %c0_12] : memref<4x256xf32, #tpu.memory_space<vmem>>, vector<4x256xf32>
    %28 = arith.addf %16, %22 : vector<4x256xf32>
    %29 = arith.addf %27, %28 : vector<4x256xf32>
    %c0_13 = arith.constant 0 : index
    %c0_14 = arith.constant 0 : index
    %30 = vector.load %arg6[%c0_13, %c0_14] : memref<4x256xf32, #tpu.memory_space<vmem>>, vector<4x256xf32>
    tpu.vector_store %arg6[%c0_13, %c0_14], %29 {strides = array<i32>} : memref<4x256xf32, #tpu.memory_space<vmem>>, vector<4x256xf32>,
    %c0_15 = arith.constant 0 : index
    %c0_16 = arith.constant 0 : index
    %31 = vector.load %arg7[%c0_15, %c0_16] : memref<4x256xf32, #tpu.memory_space<vmem>>, vector<4x256xf32>
    %32 = vector.broadcast %17 : vector<1x256xf32> to vector<4x256xf32>
    %33 = arith.subf %32, %10 : vector<4x256xf32>
    %34 = arith.mulf %22, %33 : vector<4x256xf32>
    %35 = arith.addf %31, %34 : vector<4x256xf32>
    %c0_17 = arith.constant 0 : index
    %c0_18 = arith.constant 0 : index
    %36 = vector.load %arg7[%c0_17, %c0_18] : memref<4x256xf32, #tpu.memory_space<vmem>>, vector<4x256xf32>
    tpu.vector_store %arg7[%c0_17, %c0_18], %35 {strides = array<i32>} : memref<4x256xf32, #tpu.memory_space<vmem>>, vector<4x256xf32>,
    %c0_i32_19 = arith.constant 0 : i32
    %37 = arith.cmpi eq, %arg1, %c0_i32_19 : i32
    %38 = arith.extui %37 : i1 to i32
    %c0_i32_20 = arith.constant 0 : i32
    %39 = arith.cmpi ne, %38, %c0_i32_20 : i32
    scf.if %39 {
      %c0_21 = arith.constant 0 : index
      %c0_22 = arith.constant 0 : index
      %40 = vector.load %arg5[%c0_21, %c0_22] : memref<4x256xf32, #tpu.memory_space<vmem>>, vector<4x256xf32>
      %cst_23 = arith.constant dense<0.000000e+00> : vector<4xf32>
      %41 = vector.multi_reduction <add>, %40, %cst_23 [1] : vector<4x256xf32> to vector<4xf32>
      %42 = vector.shape_cast %41 : vector<4xf32> to vector<4x1xf32>
      %c0_24 = arith.constant 0 : index
      %c0_25 = arith.constant 0 : index
      %43 = vector.load %arg6[%c0_24, %c0_25] : memref<4x256xf32, #tpu.memory_space<vmem>>, vector<4x256xf32>
      %cst_26 = arith.constant dense<0.000000e+00> : vector<4xf32>
      %44 = vector.multi_reduction <add>, %43, %cst_26 [1] : vector<4x256xf32> to vector<4xf32>
      %45 = vector.shape_cast %44 : vector<4xf32> to vector<4x1xf32>
      %c0_27 = arith.constant 0 : index
      %c0_28 = arith.constant 0 : index
      %46 = vector.load %arg7[%c0_27, %c0_28] : memref<4x256xf32, #tpu.memory_space<vmem>>, vector<4x256xf32>
      %cst_29 = arith.constant dense<0.000000e+00> : vector<4xf32>
      %47 = vector.multi_reduction <add>, %46, %cst_29 [1] : vector<4x256xf32> to vector<4xf32>
      %48 = vector.shape_cast %47 : vector<4xf32> to vector<4x1xf32>
      %49 = tpu.concatenate %42, %45, %48 in 1 : vector<4x1xf32>, vector<4x1xf32>, vector<4x1xf32> -> vector<4x3xf32>
      %c0_30 = arith.constant 0 : index
      %c0_31 = arith.constant 0 : index
      %c0_32 = arith.constant 0 : index
      %50 = vector.load %arg4[%c0_30, %c0_31, %c0_32] : memref<1x4x3xf32, #tpu.memory_space<vmem>>, vector<1x4x3xf32>
      %51 = vector.shape_cast %50 : vector<1x4x3xf32> to vector<4x3xf32>
      %52 = vector.shape_cast %49 : vector<4x3xf32> to vector<1x4x3xf32>
      tpu.vector_store %arg4[%c0_30, %c0_31, %c0_32], %52 {strides = array<i32>} : memref<1x4x3xf32, #tpu.memory_space<vmem>>, vector<1x4x3xf32>,
    } else {
    }
    return
  }
  func.func @transform_0(%arg0: i32, %arg1: i32) -> (i32, i32, i32) {
    %c0_i32 = arith.constant 0 : i32
    %c0_i32_0 = arith.constant 0 : i32
    return %arg0, %c0_i32, %arg1 : i32, i32, i32
  }
  func.func @transform_1(%arg0: i32, %arg1: i32) -> (i32, i32, i32) {
    %c0_i32 = arith.constant 0 : i32
    %c0_i32_0 = arith.constant 0 : i32
    return %arg0, %c0_i32, %arg1 : i32, i32, i32
  }
  func.func @transform_2(%arg0: i32, %arg1: i32) -> (i32, i32, i32) {
    %c0_i32 = arith.constant 0 : i32
    %c0_i32_0 = arith.constant 0 : i32
    %c0_i32_1 = arith.constant 0 : i32
    return %arg0, %c0_i32, %c0_i32_0 : i32, i32, i32
  }
}

</mosaic_0001>

<bundles_post_ra>
// kernel: _ds_loss_from_flat.1
= control target key start
LH: loop header
LB: loop body
LE: loop exit
PB: predicated region body
PF: predicated region fallthrough
CT: control target
= control target key end

     0   :  { %7 = vsyncpa [#allocation6], 0  ;;  %s826_s0 = inlined_call_operand.hbm [shape: f32[2,4,256], index: 0, kind: input, shape index: {}]   ;;  %s827_s1 = inlined_call_operand.hbm [shape: s32[2,1,256], index: 1, kind: input, shape index: {}]   ;;  %s828_s2 = inlined_call_operand.vmem [shape: f32[2,4,3], index: 2, kind: output, shape index: {}]  }
   0x1   :  { %9 = vsyncpa [#allocation6 + $0x1], 0 }
   0x2   :  { %10 = vsyncpa [#allocation8], 0 }
   0x3   :  { %12 = vsyncpa [#allocation8 + $0x1], 0  ;;  %s685_s9 = smov 0   ;;  %s687_s10 = smov 0  }
   0x4   :  { %s689_s11 = smov 0   ;;  %s691_s12 = smov 0  }
   0x5   :  { %s693_s13 = smov 0   ;;  %s695_s14 = smov 0  }
   0x6 LB: > { %s462_s15 = sadd.s32 4294967295, %s665_s14   ;;  %s30_s16 = sadd.s32 1, %s661_s13  ;;  %s665_s14 = sphi %s695_s14, %s18_s14   ;;  %s661_s13 = sphi %s693_s13, %s837_s13   ;;  %s657_s12 = sphi %s691_s12, %s836_s12   ;;  %s653_s11 = sphi %s689_s11, %s835_s11   ;;  %s649_s10 = sphi %s687_s10, %s834_s10   ;;  %s645_s9 = sphi %s685_s9, %s833_s9  }
   0x7   : > { %p32_p0 = scmp.ge.s32.totalorder %s30_s16, 2  ;;  %s39_s17 = sadd.s32 1, %s653_s11 }
   0x8   : > { %p46_p1 = scmp.ne.s32.totalorder %s653_s11, %s649_s10  ;;  %p47_p2 = scmp.eq.s32.totalorder %s665_s14, 0 }
   0x9   : > { %s839_s16 = smov (%p32_p0, %s30_s16), 0  ;;  %p52_p4 = scmp.ne.s32.totalorder %s649_s10, %s645_s9 }
   0xa   : > { %p721_p3 = por %p47_p2, %p46_p1  ;;  %s34_s19 = ssub.s32 %s661_s13, %s839_s16 }
   0xb   : > { %p53_p5 = scmp.eq.s32.totalorder %s462_s15, 0  ;;  %p37_p6 = scmp.eq.s32.totalorder %s34_s19, 0 }
   0xc   : > { %p494_p8 = scmp.lt.s32.totalorder %s665_s14, 2  ;;  %s737_s22 = sand.u32 1, %s653_s11  }
   0xd   : > { %p728_p7 = por %p53_p5, %p52_p4  ;;  %s480_s23 = sshll.u32 %s661_s13, 7 }
   0xe   : > { %s734_s21 = scalar_select %p37_p6, %s653_s11, %s39_s17  }
   0xf   : > { %s466_s24 = sshll.u32 %s737_s22, 3  ;;  %s142_s27 = scalar_lea.hbm %s826_s0, %s480_s23 }
  0x10   : > { %s134_s28 = scalar_lea.vmem [#allocation5], %s466_s24  ;;  %p746_p9 = pnand %p494_p8, %p721_p3 }
  0x11   : > { %s144_s29 = sshll.u32 %s134_s28, 4  ;;  %p472_p10 = scmp.ge.s32.totalorder %s665_s14, 1  ;;  %s145_s29 = int_to_ptr.vmem [resolvable:$true] %s144_s29 }
  0x12   : > { %p170_p11 = scmp.lt.s32.totalorder %s665_s14, 3  ;;  %s131_s3 = scalar_lea.sflag [#allocation6], %s737_s22 }
  0x13   : > { %p557_p12 = pneg %p746_p9  ;;  %s568_s4 = scalar_lea.vmem %s145_s29, 128 }
  0x14   : > { %p569_p13 = scmp.ne.s32.totalorder %s145_s29, %s568_s4  ;;  %s667_s5 = smov [#allocation5]  }
  0x15   : > { %s573_s6 = sshll.u32 %s667_s5, 4  ;;  %s574_s6 = int_to_ptr.vmem [resolvable:$false] %s573_s6 }
  0x16   : > { %p571_p0 = pnand %p569_p13, %p557_p12  ;;  %s575_s7 = scalar_lea.vmem %s574_s6, 256 }
  0x17   : > { %p576_p2 = scmp.lt.s32.totalorder %s145_s29, %s574_s6  ;;  %p577_p3 = scmp.lt.s32.totalorder %s575_s7, %s568_s4 }
  0x18   : > { %p572_p1 = pneg %p571_p0 }
  0x19   : > { %p578_p4 = por %p577_p3, %p576_p2 }
  0x1b   : > { %p579_p5 = pnand %p578_p4, %p572_p1 }
  0x1d   : > { %582 = shalt.err (!%p579_p5)
}
  0x1e   : > { %490 = dma.hbm_to_vmem [thread:$0]  (!%p746_p9), %s142_s27, 128, %s145_s29, %s131_s3  }
  0x1f   : > { %p764_p6 = pnand %p472_p10, %p170_p11  ;;  %s469_s9 = sshll.u32 %s737_s22, 1 }
  0x20   : > { %s481_s15 = sshll.u32 %s661_s13, 5  ;;  %s155_s23 = scalar_lea.vmem [#allocation7], %s469_s9 }
  0x21   : > { %s163_s19 = scalar_lea.hbm %s827_s1, %s481_s15  ;;  %s165_s24 = sshll.u32 %s155_s23, 4  ;;  %s166_s24 = int_to_ptr.vmem [resolvable:$true] %s165_s24 }
  0x22   : > { %s152_s25 = scalar_lea.sflag [#allocation8], %s737_s22  ;;  %s596_s26 = scalar_lea.vmem %s166_s24, 32 }
  0x23   : > { %p597_p8 = scmp.ne.s32.totalorder %s166_s24, %s596_s26  ;;  %s668_s27 = smov [#allocation7]  }
  0x24   : > { %s601_s28 = sshll.u32 %s668_s27, 4  ;;  %s602_s28 = int_to_ptr.vmem [resolvable:$false] %s601_s28 }
  0x25   : > { %p599_p13 = pnand %p597_p8, %p557_p12  ;;  %s603_s29 = scalar_lea.vmem %s602_s28, 64 }
  0x26   : > { %p604_p10 = scmp.lt.s32.totalorder %s166_s24, %s602_s28  ;;  %p605_p11 = scmp.lt.s32.totalorder %s603_s29, %s596_s26 }
  0x27   : > { %p600_p0 = pneg %p599_p13 }
  0x28   : > { %p606_p1 = por %p605_p11, %p604_p10 }
  0x2a   : > { %p607_p2 = pnand %p606_p1, %p600_p0 }
  0x2c   : > { %610 = shalt.err (!%p607_p2)
}
  0x2d   : > { %493 = dma.hbm_to_vmem [thread:$0]  (!%p746_p9), %s163_s19, 32, %s166_s24, %s152_s25  }
  0x2e   : > { %174 = sbr.rel (%p764_p6) target bundleno = 276 (0x114), region = 28  ;;  %s176_s22 = sand.u32 (!%p764_p6), 1, %s649_s10  }
  0x2f   : > { %s473_s3 = sshll.u32 (!%p764_p6), %s176_s22, 3  ;;  %s177_s4 = scalar_lea.sflag (!%p764_p6), [#allocation6], %s176_s22 }
  0x30   : > { %s180_s5 = scalar_lea.vmem (!%p764_p6), [#allocation5], %s473_s3 }
  0x33   : > { %636 = dma.done.wait (%p728_p7), %s177_s4, 128  }
  0x34   : > { %638 = vsyncadd (%p728_p7), %s177_s4, 4294967168  ;;  %s474_s6 = sshll.u32 %s176_s22, 1  ;;  %s186_s7 = scalar_lea.sflag [#allocation8], %s176_s22 }
  0x35   : > { %s786_s9 = scalar_lea.vmem [#allocation7], %s474_s6 }
  0x36   : > { %640 = dma.done.wait (%p728_p7), %s186_s7, 32  }
  0x37   : > { %642 = vsyncadd (%p728_p7), %s186_s7, 4294967264  ;;  %vm232_vm0 = vcmask 1043456   ;;  %v227_v0 = vld [vmem:[%s180_s5] sm:$0xff]  ;;  %v282_v30 = vlaneseq  ;;  %v228_v39 = vld [vmem:[%s786_s9] sm:$0x3]  ;;  %v669_v43 = vmov 0.0  }
  0x38   : > { %v230_v1 = vcombine.high %v227_v0, %v227_v0  ;;  %v233_v2 = vsel %vm232_vm0, %v227_v0, -inf  ;;  %p216_p7 = scmp.lt.s32.totalorder %s657_s12, 1  ;;  %vm354_vm3 = vcmask 7168   ;;  %vm356_vm4 = vcmask 15360  }
  0x39   : > { %v234_v3 = vrot.slane %v233_v2, 4  ;;  %v283_v35 = vshrl.u32 %v282_v30, 7  ;;  %vm358_vm5 = vcmask 19456  }
  0x3a   : > { %v240_v4 = vsel %vm232_vm0, %v230_v1, -inf  ;;  %s841_s12 = smov (!%p216_p7, %s657_s12), 1 }
  0x3b   : > { %v235_v5 = vmax.f32 %v233_v2, %v234_v3  ;;  %v241_v6 = vrot.slane %v240_v4, 4  ;;  %v286_v37 = vsub.s32 0, %v283_v35  ;;  %v290_v38 = vsub.s32 1, %v283_v35  ;;  %s475_s20 = sshll.u32 %s841_s12, 2 }
  0x3c   : > { %s219_s15 = scalar_lea.vmem %s828_s2, %s475_s20 }
  0x3d   : > { %v236_v7 = vrot.slane %v235_v5, 2  ;;  %v242_v8 = vmax.f32 %v240_v4, %v241_v6  ;;  %v287_v40 = vrot.slane %v228_v39, %v286_v37  ;;  %v291_v41 = vrot.slane %v228_v39, %v290_v38 }
  0x3f   : > { %v237_v9 = vmax.f32 %v235_v5, %v236_v7  ;;  %v243_v10 = vrot.slane %v242_v8, 2  ;;  %vm292_vm1 = vcmp.eq.s32.totalorder %v283_v35, %v287_v40  ;;  %vm293_vm2 = vcmp.eq.s32.totalorder %v283_v35, %v291_v41 }
  0x40   : > { %v476_v44 = vsel %vm292_vm1, 1.0, %v669_v43  ;;  %v477_v45 = vsel %vm293_vm2, 1.0, %v669_v43 }
  0x41   : > { %v238_v11 = vrot.slane %v237_v9, 1  ;;  %v244_v12 = vmax.f32 %v242_v8, %v243_v10  ;;  %v301_v52 = vcombine.low %v476_v44, %v477_v45 }
  0x43   : > { %v239_v13 = vmax.f32 %v237_v9, %v238_v11  ;;  %v245_v14 = vrot.slane %v244_v12, 1 }
  0x45   : > { %v246_v15 = vmax.f32 %v244_v12, %v245_v14 }
  0x47   : > { %v249_v16 = vcombine.low %v239_v13, %v246_v15 }
  0x49   : > { %v251_v17 = vsub.f32 %v227_v0, %v249_v16 }
  0x4b   : > { %v252_v18 = vmul.f32 1.442695, %v251_v17  ;;  %v312_v49 = vcombine.high %v251_v17, %v251_v17 }
  0x4d   : > { %545 = vpow2.f32 %v252_v18 }
  0x5a   : > { %v546_v19 = vpop.eup %545 }
  0x5b   : > { %v255_v20 = vcombine.high %v546_v19, %v546_v19  ;;  %v257_v21 = vsel %vm232_vm0, %v546_v19, 0.0 }
  0x5c   : > { %v258_v22 = vrot.slane %v257_v21, 4 }
  0x5d   : > { %v264_v23 = vsel %vm232_vm0, %v255_v20, 0.0 }
  0x5e   : > { %v259_v24 = vadd.f32 %v258_v22, %v257_v21  ;;  %v265_v25 = vrot.slane %v264_v23, 4 }
  0x60   : > { %v260_v26 = vrot.slane %v259_v24, 2  ;;  %v266_v27 = vadd.f32 %v265_v25, %v264_v23 }
  0x62   : > { %v261_v28 = vadd.f32 %v260_v26, %v259_v24  ;;  %v267_v29 = vrot.slane %v266_v27, 2 }
  0x64   : > { %v262_v31 = vrot.slane %v261_v28, 1  ;;  %v268_v32 = vadd.f32 %v267_v29, %v266_v27 }
  0x66   : > { %v263_v33 = vadd.f32 %v262_v31, %v261_v28  ;;  %v269_v34 = vrot.slane %v268_v32, 1 }
  0x68   : > { %v270_v36 = vadd.f32 %v269_v34, %v268_v32  ;;  %547 = vrcp.f32 %v263_v33 }
  0x69   : > { %549 = vlog2.f32 %v263_v33 }
  0x6a   : > { %551 = vrcp.f32 %v270_v36 }
  0x6b   : > { %553 = vlog2.f32 %v270_v36 }
  0x75   : > { %v548_v42 = vpop.eup %547 }
  0x76   : > { %v550_v46 = vpop.eup %549 }
  0x77   : > { %v552_v47 = vpop.eup %551  ;;  %v279_v48 = vmul.f32 0.6931472, %v550_v46 }
  0x78   : > { %v554_v50 = vpop.eup %553  ;;  %v275_v51 = vcombine.low %v548_v42, %v552_v47 }
  0x79   : > { %v281_v53 = vmul.f32 0.6931472, %v554_v50  ;;  %v314_v54 = vsub.f32 %v279_v48, %v251_v17 }
  0x7a   : > { %v277_v55 = vmul.f32 %v546_v19, %v275_v51 }
  0x7b   : > { %v315_v56 = vsub.f32 %v281_v53, %v312_v49  ;;  %v316_v57 = vmul.f32 %v476_v44, %v314_v54 }
  0x7c   : > { %v303_v58 = vmul.f32 %v301_v52, %v277_v55  ;;  %v307_v59 = vadd.f32 %v301_v52, %v277_v55 }
  0x7d   : > { %v317_v60 = vmul.f32 %v477_v45, %v315_v56 }
  0x7e   : > { %v329_v61 = vcombine.high %v303_v58, %v303_v58  ;;  %v331_v62 = vsel %vm232_vm0, %v303_v58, 0.0  ;;  %v338_v63 = vcombine.high %v307_v59, %v307_v59  ;;  %v340_v3 = vsel %vm232_vm0, %v307_v59, 0.0 }
  0x7f   : > { %v320_v0 = vcombine.low %v316_v57, %v317_v60  ;;  %v482_v1 = vcombine.low %v317_v60, %v317_v60 }
  0x80   : > { %v332_v2 = vsel %vm232_vm0, %v329_v61, 0.0  ;;  %v341_v4 = vsel %vm232_vm0, %v338_v63, 0.0 }
  0x81   : > { %v333_v5 = vadd.f32 %v332_v2, %v331_v62  ;;  %v349_v6 = vsel %vm232_vm0, %v320_v0, 0.0  ;;  %v350_v7 = vsel %vm232_vm0, %v482_v1, 0.0  ;;  %v342_v9 = vadd.f32 %v341_v4, %v340_v3 }
  0x82   : > { %v351_v8 = vadd.f32 %v350_v7, %v349_v6 }
  0x83   : > { %334 = vadd.xlane.f32.xlu0 %v333_v5 }
  0x84   : > { %352 = vadd.xlane.f32.xlu1 %v351_v8 }
  0x87   : > { %343 = vadd.xlane.f32.xlu0 %v342_v9 }
 0x10c   : > { %v335_v10 = vpop.xlane.xlu0 %334 }
 0x10d   : > { %v353_v11 = vpop.xlane.xlu1 %352 }
 0x110   : > { %v344_v12 = vpop.xlane.xlu0 %343 }
 0x111   : > { %v355_v13 = vsel %vm354_vm3, %v335_v10, %v344_v12 }
 0x112   : > { %v357_v14 = vsel %vm356_vm4, %v355_v13, %v353_v11 }
 0x113   : > { %359 = vst.msk [vmem:[%s219_s15] sm:$0xf] %vm358_vm5, %v357_v14 }
 0x114 PF: > { %s18_s14 = sadd.s32 1, %s665_s14   ;;  %s833_s9 = smov %s649_s10 }
 0x115   : > { %p15_p9 = scmp.ge.s32.totalorder %s18_s14, 4   ;;  %s834_s10 = smov %s653_s11 }
 0x116   : > { %s835_s11 = smov %s734_s21  ;;  %s836_s12 = smov %s661_s13 }
 0x117   : > { %s837_s13 = smov %s839_s16  ;;  %17 = sbr.rel (!%p15_p9) target bundleno = 6 (0x6), region = 89 }
 0x11c   :  { %379 = vsyncpa [#allocation6], 1 }
 0x11d   :  { %381 = vsyncpa [#allocation6 + $0x1], 1 }
 0x11e   :  { %382 = vsyncpa [#allocation8], 1 }
 0x11f   :  { %384 = vsyncpa [#allocation8 + $0x1], 1 }

</bundles_post_ra>
